<compile_context>
chip_gen: v7x
topology: tpu7x:2x2x1
jax: 0.10.0
libtpu: 0.0.40
codegen_flags: <defaults>
</compile_context>

<pallas_src>
import functools

import jax
import jax.numpy as jnp
from jax import lax
from jax.experimental import pallas as pl
from jax.experimental.pallas import tpu as pltpu

BOX_THRESHOLD = 0.35
TEXT_THRESHOLD = 0.25

IMAGENET_MEAN = (0.485, 0.456, 0.406)
IMAGENET_STD = (0.229, 0.224, 0.225)


# ----------------------------------------------------------------------------
# Kernel 1: fused ToTensor + Normalize   out = u8.astype(f32) * scale + bias
#   scale = 1 / (255 * std),  bias = -mean / std   (compile-time constants)
#   Channel is a grid axis; scale/bias selected with a scalar select.
# ----------------------------------------------------------------------------
def _normalize_kernel(img_ref, out_ref, *, scale, bias):
    # img_ref / out_ref: (tile_rows, 128)  -- channel & batch squeezed out.
    c = pl.program_id(1)                                # channel grid index
    s = jnp.float32(scale[-1])
    b = jnp.float32(bias[-1])
    for ch in range(len(scale) - 2, -1, -1):            # scalar select chain
        s = jnp.where(c == ch, jnp.float32(scale[ch]), s)
        b = jnp.where(c == ch, jnp.float32(bias[ch]), b)
    out_ref[...] = img_ref[...].astype(jnp.float32) * s + b


def _plan_rows(hw):
    """Pick (padded_rows, tile_rows) for the (rows, 128) pixel layout.

    rows are padded to a multiple of 32 (clean u8 sublane tiling); the tile is
    the largest multiple-of-32 candidate whose padding waste is <= 10%, so
    blocks stay large (>= ~64K pixels at realistic image sizes) while small or
    odd-sized images just get a single modest block.
    """
    rows = -(-hw // 128)                       # ceil(hw / 128)
    rows32 = ((rows + 31) // 32) * 32
    for cand in (4096, 2048, 1024, 512, 256, 128, 64, 32):
        if cand > rows32:
            continue
        padded = ((rows32 + cand - 1) // cand) * cand
        if (padded - rows) / rows <= 0.10:
            return padded, cand
    return rows32, rows32


def normalize_images(images_u8_nhwc):
    """images_u8_nhwc: (B, H, W, C) uint8 -> (B, C, H, W) float32 normalized."""
    B, H, W, C = images_u8_nhwc.shape
    hw = H * W
    rows_padded, tile_rows = _plan_rows(hw)
    hw_padded = rows_padded * 128

    scale = tuple(float(1.0 / (255.0 * s)) for s in IMAGENET_STD[:C])
    bias = tuple(float(-m / s) for m, s in zip(IMAGENET_MEAN[:C],
                                               IMAGENET_STD[:C]))

    # NHWC -> NCHW on the uint8 array (4x cheaper than transposing f32).
    # TODO(synk): drop this transpose if the downstream backbone accepts NHWC.
    imgs = jnp.transpose(images_u8_nhwc, (0, 3, 1, 2)).reshape(B, C, hw)
    if hw_padded != hw:
        imgs = jnp.pad(imgs, ((0, 0), (0, 0), (0, hw_padded - hw)))
    imgs = imgs.reshape(B, C, rows_padded, 128)

    out = pl.pallas_call(
        functools.partial(_normalize_kernel, scale=scale, bias=bias),
        out_shape=jax.ShapeDtypeStruct((B, C, rows_padded, 128), jnp.float32),
        grid_spec=pltpu.PrefetchScalarGridSpec(
            num_scalar_prefetch=0,
            grid=(B, C, rows_padded // tile_rows),
            in_specs=[pl.BlockSpec((None, None, tile_rows, 128),
                                   lambda b, c, r: (b, c, r, 0))],
            out_specs=pl.BlockSpec((None, None, tile_rows, 128),
                                   lambda b, c, r: (b, c, r, 0)),
        ),
        compiler_params=pltpu.CompilerParams(
            dimension_semantics=("parallel", "parallel", "parallel")),
    )(imgs)

    out = out.reshape(B, C, hw_padded)
    if hw_padded != hw:
        out = out[:, :, :hw]
    return out.reshape(B, C, H, W)


# ----------------------------------------------------------------------------
# Kernel 2: fused detection head + post-processing, tiled over M = B*Q
#   raw   = feat_bf16 @ [W_logits | W_boxes | 0pad]_bf16 (f32 acc) + bias
#   sig   = sigmoid(raw)              (cols [0:T) = probs, [T:T+4) = boxes)
#   maxp  = max over the first T cols ; mask = maxp > 0.35
#   out slab cols: [0:T) probs | [T:T+4) boxes | [T+4] maxp | [T+5] mask | 0
# ----------------------------------------------------------------------------
def _det_head_kernel(feat_ref, w_ref, b_ref, out_ref, *, num_tokens, num_box):
    f = feat_ref[...]                                               # (TM, D) bf16
    raw = jnp.dot(f, w_ref[...], preferred_element_type=jnp.float32)
    raw = raw + b_ref[...]                                          # (TM, Npad) f32
    sig = jax.nn.sigmoid(raw)

    col = lax.broadcasted_iota(jnp.int32, sig.shape, 1)
    probs_only = jnp.where(col < num_tokens, sig, -jnp.inf)
    maxp = jnp.max(probs_only, axis=-1, keepdims=True)              # (TM, 1)
    mask = (maxp > BOX_THRESHOLD).astype(jnp.float32)               # (TM, 1)

    tb = num_tokens + num_box
    slab = jnp.where(col < tb, sig,
           jnp.where(col == tb, maxp,
           jnp.where(col == tb + 1, mask, 0.0)))
    out_ref[...] = slab                         # single lane-dense store


def detection_head_and_postprocess(features, w_logits, b_logits,
                                   w_boxes, b_boxes, *, tile_m=512,
                                   matmul_dtype=jnp.bfloat16):
    """features: (B, Q, D) f32 -> probs, boxes, max_prob, box_mask, posmap."""
    B, Q, D = features.shape
    T = w_logits.shape[1]
    nb = w_boxes.shape[1]
    width = T + nb + 2                       # probs | boxes | maxp | mask
    n_pad = ((width + 127) // 128) * 128     # lane-dense / MXU-friendly N

    # Fuse the two heads into one weight/bias, zero-pad to n_pad.  (glue)
    w_cat = jnp.pad(jnp.concatenate([w_logits, w_boxes], axis=1),
                    ((0, 0), (0, n_pad - (T + nb)))).astype(matmul_dtype)
    b_cat = jnp.pad(jnp.concatenate([b_logits, b_boxes], axis=1),
                    ((0, 0), (0, n_pad - (T + nb)))).astype(jnp.float32)

    M = B * Q                                # fold batch into matmul M
    tm = min(tile_m, ((M + 15) // 16) * 16)  # multiple of 16 (bf16 sublanes)
    m_pad = ((M + tm - 1) // tm) * tm
    feat2d = features.reshape(M, D).astype(matmul_dtype)
    if m_pad != M:
        feat2d = jnp.pad(feat2d, ((0, m_pad - M), (0, 0)))

    slab = pl.pallas_call(
        functools.partial(_det_head_kernel, num_tokens=T, num_box=nb),
        out_shape=jax.ShapeDtypeStruct((m_pad, n_pad), jnp.float32),
        grid_spec=pltpu.PrefetchScalarGridSpec(
            num_scalar_prefetch=0,
            grid=(m_pad // tm,),
            in_specs=[
                pl.BlockSpec((tm, D), lambda m: (m, 0)),        # feat tile
                pl.BlockSpec((D, n_pad), lambda m: (0, 0)),     # resident W
                pl.BlockSpec((1, n_pad), lambda m: (0, 0)),     # resident b
            ],
            out_specs=pl.BlockSpec((tm, n_pad), lambda m: (m, 0)),
        ),
        compiler_params=pltpu.CompilerParams(
            dimension_semantics=("parallel",)),
    )(feat2d, w_cat, b_cat)

    slab = slab[:M]
    probs = slab[:, :T].reshape(B, Q, T)
    boxes = slab[:, T:T + nb].reshape(B, Q, nb)
    max_prob = slab[:, T + nb].reshape(B, Q, 1)
    box_mask = slab[:, T + nb + 1].reshape(B, Q, 1)
    # posmap is a cheap compare on an array we already have; derive in JAX
    # instead of duplicating the largest (B, Q, T) writeback in the kernel.
    posmap = (probs > TEXT_THRESHOLD).astype(jnp.float32)
    return probs, boxes, max_prob, box_mask, posmap


# ----------------------------------------------------------------------------
# Detector forward (numeric parts)
# ----------------------------------------------------------------------------
def detector_forward(images_u8_nhwc, features, params):
    # 1) load_image: ToTensor + Normalize  (Pallas kernel)
    normalized = normalize_images(images_u8_nhwc)

    # TODO(synk): the GroundingDINO Swin+BERT+DETR backbone that maps
    # `normalized` images + caption tokens to per-query features has no clean
    # Pallas equivalent; a deterministic synthetic feature tensor stands in.

    # 2) detection head + sigmoid/max/threshold post-processing (Pallas kernel)
    probs, boxes, max_prob, box_mask, posmap = detection_head_and_postprocess(
        features, params["w_logits"], params["b_logits"],
        params["w_boxes"], params["b_boxes"])

    # 3) per-image detection count (== len(phrases) in the reference)  (glue)
    counts = jnp.sum(box_mask, axis=(1, 2)).astype(jnp.int32)

    # TODO(synk): tokenizer phrase extraction (get_phrases_from_posmap) and PIL
    # box drawing (plot_boxes_to_image) are string/PIL ops with no Pallas
    # equivalent; posmap/box_mask/boxes contain all their numeric inputs.
    return {
        "normalized_images": normalized,
        "pred_probs": probs,
        "pred_boxes": boxes,
        "max_prob": max_prob,
        "box_mask": box_mask,
        "text_posmap": posmap,
        "counts": counts,
    }


if __name__ == "__main__":
    # Small shapes consistent with the forward pass:
    B, H, W, C = 2, 16, 16, 3      # batch of RGB observations
    Q, D, T = 16, 32, 8            # queries, hidden dim, caption tokens

    key = jax.random.PRNGKey(0)
    k_img, k_feat, k_wl, k_bl, k_wb, k_bb = jax.random.split(key, 6)

    images = jax.random.randint(k_img, (B, H, W, C), 0, 256,
                                dtype=jnp.int32).astype(jnp.uint8)
    features = jax.random.normal(k_feat, (B, Q, D), dtype=jnp.float32)

    params = {
        "w_logits": jax.random.normal(k_wl, (D, T), jnp.float32) * 0.3,
        "b_logits": jax.random.normal(k_bl, (1, T), jnp.float32) * 0.1,
        "w_boxes": jax.random.normal(k_wb, (D, 4), jnp.float32) * 0.3,
        "b_boxes": jax.random.normal(k_bb, (1, 4), jnp.float32) * 0.1,
    }

    out = detector_forward(images, features, params)
    jax.block_until_ready(out)

    # --- sanity checks against plain-JAX references ---
    # Normalize (exact f32 semantics of ToTensor + Normalize)
    mean = jnp.array(IMAGENET_MEAN).reshape(1, 3, 1, 1)
    std = jnp.array(IMAGENET_STD).reshape(1, 3, 1, 1)
    ref_norm = (jnp.transpose(images, (0, 3, 1, 2)).astype(jnp.float32) / 255.0
                - mean) / std
    assert jnp.allclose(out["normalized_images"], ref_norm, atol=1e-5)

    # Detection head: reference with the same bf16-operand / f32-accum matmul.
    f_bf = features.astype(jnp.bfloat16).reshape(-1, D)
    ref_probs = jax.nn.sigmoid(
        jnp.dot(f_bf, params["w_logits"].astype(jnp.bfloat16),
                preferred_element_type=jnp.float32).reshape(B, Q, T)
        + params["b_logits"])
    ref_boxes = jax.nn.sigmoid(
        jnp.dot(f_bf, params["w_boxes"].astype(jnp.bfloat16),
                preferred_element_type=jnp.float32).reshape(B, Q, 4)
        + params["b_boxes"])
    assert jnp.allclose(out["pred_probs"], ref_probs, atol=1e-3)
    assert jnp.allclose(out["pred_boxes"], ref_boxes, atol=1e-3)

    # Loose check against the pure-f32 reference (guards gross errors).
    ref_probs_f32 = jax.nn.sigmoid(features @ params["w_logits"]
                                   + params["b_logits"])
    assert jnp.allclose(out["pred_probs"], ref_probs_f32, atol=3e-2)

    # Internal consistency of the packed post-processing outputs.
    assert jnp.allclose(out["max_prob"][..., 0], out["pred_probs"].max(-1),
                        atol=1e-6)
    assert jnp.array_equal(
        out["box_mask"][..., 0],
        (out["max_prob"][..., 0] > BOX_THRESHOLD).astype(jnp.float32))
    assert jnp.array_equal(
        out["text_posmap"],
        (out["pred_probs"] > TEXT_THRESHOLD).astype(jnp.float32))
    assert jnp.array_equal(out["counts"],
                           jnp.sum(out["box_mask"][..., 0] > 0.5,
                                   axis=1).astype(jnp.int32))

    print("KERNEL_OK")
</pallas_src>

<mosaic_0001>
module attributes {stable_mosaic.version = 11 : i64} {
  func.func @_normalize_kernel(%arg0: i32, %arg1: i32, %arg2: i32, %arg3: memref<1x1x32x128xi8, #tpu.memory_space<vmem>>, %arg4: memref<1x1x32x128xf32, #tpu.memory_space<vmem>>) attributes {dimension_semantics = [#tpu.dimension_semantics<parallel>, #tpu.dimension_semantics<parallel>, #tpu.dimension_semantics<parallel>], iteration_bounds = array<i64: 2, 3, 1>, scalar_prefetch = 0 : i64, scratch_operands = 0 : i64, tpu.core_type = #tpu.core_type<tc>, window_params = [{transform_indices = @transform_0, window_bounds = array<i64: 1, 1, 32, 128>}, {transform_indices = @transform_1, window_bounds = array<i64: 1, 1, 32, 128>}]} {
    %c1_i32 = arith.constant 1 : i32
    %0 = arith.cmpi eq, %arg1, %c1_i32 : i32
    %cst = arith.constant 0.0175070036 : f32
    %cst_0 = arith.constant 0.0174291935 : f32
    %1 = arith.select %0, %cst, %cst_0 : f32
    %c1_i32_1 = arith.constant 1 : i32
    %2 = arith.cmpi eq, %arg1, %c1_i32_1 : i32
    %cst_2 = arith.constant -2.03571439 : f32
    %cst_3 = arith.constant -1.80444443 : f32
    %3 = arith.select %2, %cst_2, %cst_3 : f32
    %c0_i32 = arith.constant 0 : i32
    %4 = arith.cmpi eq, %arg1, %c0_i32 : i32
    %cst_4 = arith.constant 0.0171247534 : f32
    %5 = arith.select %4, %cst_4, %1 : f32
    %c0_i32_5 = arith.constant 0 : i32
    %6 = arith.cmpi eq, %arg1, %c0_i32_5 : i32
    %cst_6 = arith.constant -2.11790395 : f32
    %7 = arith.select %6, %cst_6, %3 : f32
    %c0 = arith.constant 0 : index
    %c0_7 = arith.constant 0 : index
    %c0_8 = arith.constant 0 : index
    %c0_9 = arith.constant 0 : index
    %8 = vector.load %arg3[%c0, %c0_7, %c0_8, %c0_9] : memref<1x1x32x128xi8, #tpu.memory_space<vmem>>, vector<1x1x32x128xi8>
    %9 = vector.shape_cast %8 : vector<1x1x32x128xi8> to vector<32x128xi8>
    %10 = arith.uitofp %9 : vector<32x128xi8> to vector<32x128xf32>
    %11 = vector.broadcast %5 : f32 to vector<32x128xf32>
    %12 = arith.mulf %10, %11 : vector<32x128xf32>
    %13 = vector.broadcast %7 : f32 to vector<32x128xf32>
    %14 = arith.addf %12, %13 : vector<32x128xf32>
    %c0_10 = arith.constant 0 : index
    %c0_11 = arith.constant 0 : index
    %c0_12 = arith.constant 0 : index
    %c0_13 = arith.constant 0 : index
    %15 = vector.load %arg4[%c0_10, %c0_11, %c0_12, %c0_13] : memref<1x1x32x128xf32, #tpu.memory_space<vmem>>, vector<1x1x32x128xf32>
    %16 = vector.shape_cast %15 : vector<1x1x32x128xf32> to vector<32x128xf32>
    %17 = vector.shape_cast %14 : vector<32x128xf32> to vector<1x1x32x128xf32>
    tpu.vector_store %arg4[%c0_10, %c0_11, %c0_12, %c0_13], %17 {strides = array<i32>} : memref<1x1x32x128xf32, #tpu.memory_space<vmem>>, vector<1x1x32x128xf32>,
    return
  }
  func.func @transform_0(%arg0: i32, %arg1: i32, %arg2: i32) -> (i32, i32, i32, i32) {
    %c0_i32 = arith.constant 0 : i32
    %c0_i32_0 = arith.constant 0 : i32
    return %arg0, %arg1, %arg2, %c0_i32 : i32, i32, i32, i32
  }
  func.func @transform_1(%arg0: i32, %arg1: i32, %arg2: i32) -> (i32, i32, i32, i32) {
    %c0_i32 = arith.constant 0 : i32
    %c0_i32_0 = arith.constant 0 : i32
    return %arg0, %arg1, %arg2, %c0_i32 : i32, i32, i32, i32
  }
}

</mosaic_0001>

<bundles_post_ra>
// kernel: tpu_custom_call.1
= control target key start
LH: loop header
LB: loop body
LE: loop exit
PB: predicated region body
PF: predicated region fallthrough
CT: control target
= control target key end

     0   :  { %6 = vsyncpa [#allocation3], 0  ;;  %s746_s0 = inlined_call_operand.hbm [shape: u8[2,3,32,128], index: 0, kind: input, shape index: {}]   ;;  %s747_s1 = inlined_call_operand.hbm [shape: f32[2,3,32,128], index: 1, kind: output, shape index: {}]  }
   0x1   :  { %8 = vsyncpa [#allocation3 + $0x1], 0 }
   0x2   :  { %9 = vsyncpa [#allocation4], 0 }
   0x3   :  { %11 = vsyncpa [#allocation4 + $0x1], 0  ;;  %s549_s6 = smov 0   ;;  %s551_s7 = smov 0  }
   0x4   :  { %s553_s8 = smov 0   ;;  %s555_s9 = smov 0  }
   0x5   :  { %s557_s10 = smov 0   ;;  %s559_s11 = smov 0  }
   0x6   :  { %s561_s12 = smov 0   ;;  %s563_s13 = smov 0  }
   0x7 LB: > { %s309_s14 = sadd.s32 4294967295, %s533_s13   ;;  %s310_s15 = sadd.s32 4294967294, %s533_s13   ;;  %s533_s13 = sphi %s563_s13, %s17_s13   ;;  %s529_s12 = sphi %s561_s12, %s763_s12   ;;  %s525_s11 = sphi %s559_s11, %s762_s11   ;;  %s521_s10 = sphi %s557_s10, %s761_s10   ;;  %s517_s9 = sphi %s555_s9, %s760_s9   ;;  %s513_s8 = sphi %s553_s8, %s759_s8   ;;  %s509_s7 = sphi %s551_s7, %s758_s7   ;;  %s505_s6 = sphi %s549_s6, %s757_s6  }
   0x8   : > { %s32_s16 = sadd.s32 1, %s525_s11  ;;  %s36_s17 = sadd.s32 1, %s529_s12 }
   0x9   : > { %p34_p0 = scmp.ge.s32.totalorder %s32_s16, 3  ;;  %s47_s18 = sadd.s32 1, %s513_s8 }
   0xa   : > { %p54_p1 = scmp.ne.s32.totalorder %s513_s8, %s509_s7  ;;  %p55_p2 = scmp.eq.s32.totalorder %s533_s13, 0 }
   0xb   : > { %s765_s16 = smov (%p34_p0, %s32_s16), 0  ;;  %s767_s17 = smov (!%p34_p0, %s36_s17), %s529_s12 }
   0xc   : > { %s41_s19 = ssub.s32 %s525_s11, %s765_s16  ;;  %p602_p3 = por %p55_p2, %p54_p1 }
   0xd   : > { %p38_p4 = scmp.ge.s32.totalorder %s767_s17, 2  ;;  %p60_p5 = scmp.ne.s32.totalorder %s509_s7, %s505_s6 }
   0xe   : > { %p61_p6 = scmp.eq.s32.totalorder %s309_s14, 0  ;;  %p88_p7 = scmp.eq.s32.totalorder %s309_s14, 5 }
   0xf   : > { %s769_s17 = smov (%p38_p4, %s767_s17), 0  ;;  %p94_p10 = scmp.eq.s32.totalorder %s310_s15, 5 }
  0x10   : > { %p610_p8 = por %p61_p6, %p60_p5  ;;  %p614_p9 = por %p88_p7, %p54_p1 }
  0x11   : > { %s40_s23 = ssub.s32 %s529_s12, %s769_s17  ;;  %p620_p12 = por %p94_p10, %p60_p5 }
  0x12   : > { %s751_s22 = scalar_select %p614_p9, 1, 0 }
  0x13   : > { %s42_s24 = sor.u32 %s41_s19, %s40_s23  ;;  %p337_p13 = scmp.lt.s32.totalorder %s533_s13, 6 }
  0x14   : > { %p45_p11 = scmp.eq.s32.totalorder %s42_s24, 0  ;;  %s114_s26 = sand.u32 1, %s513_s8  }
  0x15   : > { %s752_s25 = scalar_select %p620_p12, 1, 0 }
  0x16   : > { %s627_s27 = scalar_select %p45_p11, %s513_s8, %s47_s18  }
  0x17   : > { %s313_s28 = sshll.u32 %s114_s26, 3  ;;  %s323_s29 = smul.u32 3, %s529_s12 }
  0x18   : > { %s118_s30 = scalar_lea.vmem [#allocation2], %s313_s28  ;;  %p632_p0 = pnand %p337_p13, %p602_p3 }
  0x19   : > { %s128_s2 = sshll.u32 %s118_s30, 4  ;;  %s124_s4 = sadd.s32 %s525_s11, %s323_s29  ;;  %s637_s2 = int_to_ptr.vmem [resolvable:$true] %s128_s2 }
  0x1a   : > { %s314_s5 = sshll.u32 %s124_s4, 7  ;;  %s115_s19 = scalar_lea.sflag [#allocation3], %s114_s26 }
  0x1b   : > { %s642_s18 = scalar_lea.hbm %s746_s0, %s314_s5  ;;  %p407_p3 = pneg %p632_p0 }
  0x1c   : > { %s405_s20 = scalar_lea.hbm %s642_s18, 128  ;;  %s410_s28 = scalar_lea.hbm %s746_s0, 768 }
  0x1d   : > { %p406_p2 = scmp.ne.s32.totalorder %s642_s18, %s405_s20  ;;  %p411_p6 = scmp.lt.u32.totalorder %s642_s18, %s746_s0 }
  0x1e   : > { %p412_p7 = scmp.lt.u32.totalorder %s410_s28, %s405_s20  ;;  %p414_p11 = scmp.lt.u32.totalorder %s405_s20, %s642_s18 }
  0x1f   : > { %p408_p4 = pnand %p407_p3, %p406_p2 }
  0x20   : > { %p413_p10 = por %p412_p7, %p411_p6 }
  0x21   : > { %p409_p5 = pneg %p408_p4 }
  0x22   : > { %p415_p13 = por %p414_p11, %p413_p10 }
  0x24   : > { %p416_p1 = pnand %p415_p13, %p409_p5 }
  0x26   : > { %419 = shalt.err (!%p416_p1)
}
  0x27   : > { %s420_s26 = scalar_lea.vmem %s637_s2, 128  ;;  %s535_s4 = smov [#allocation2]  }
  0x28   : > { %p421_p2 = scmp.ne.s32.totalorder %s637_s2, %s420_s26  ;;  %s425_s5 = sshll.u32 %s535_s4, 4  ;;  %s426_s5 = int_to_ptr.vmem [resolvable:$false] %s425_s5 }
  0x29   : > { %s427_s14 = scalar_lea.vmem %s426_s5, 256  ;;  %p428_p9 = scmp.lt.s32.totalorder %s637_s2, %s426_s5 }
  0x2a   : > { %p423_p4 = pnand %p421_p2, %p407_p3  ;;  %p429_p6 = scmp.lt.s32.totalorder %s427_s14, %s420_s26 }
  0x2c   : > { %p424_p12 = pneg %p423_p4  ;;  %p430_p7 = por %p429_p6, %p428_p9 }
  0x2e   : > { %p431_p10 = pnand %p430_p7, %p424_p12 }
  0x30   : > { %434 = shalt.err (!%p431_p10)
}
  0x31   : > { %332 = dma.hbm_to_vmem [thread:$0]  (!%p632_p0), %s642_s18, 128, %s637_s2, %s115_s19  }
  0x32   : > { %p133_p1 = scmp.lt.s32.totalorder %s533_s13, 7  ;;  %p754_p5 = scmp.ge.s32.totalorder %s533_s13, 1 }
  0x34   : > { %p134_p3 = pnand %p754_p5, %p133_p1 }
  0x35   : > { %s674_s15 = sand.u32 (!%p134_p3), 1, %s509_s7  }
  0x36   : > { %137 = sbr.rel (%p134_p3) target bundleno = 95 (0x5f), region = 24  ;;  %s316_s20 = sshll.u32 (!%p134_p3), %s674_s15, 3 }
  0x37   : > { %s140_s23 = scalar_lea.sflag (!%p134_p3), [#allocation3], %s674_s15  ;;  %s143_s24 = scalar_lea.vmem (!%p134_p3), [#allocation2], %s316_s20 }
  0x3d   : > { %496 = dma.done.wait (%p610_p8), %s140_s23, 128  }
  0x3e   : > { %498 = vsyncadd (%p610_p8), %s140_s23, 4294967168  ;;  %p163_p9 = scmp.eq.s32.totalorder %s517_s9, 1  ;;  %p166_p12 = scmp.eq.s32.totalorder %s517_s9, 0  ;;  %v169_v0 = vld [vmem:[%s143_s24] sm:$0xff] }
  0x3f   : > { %s317_s3 = sshll.u32 %s674_s15, 5  ;;  %s319_s19 = sshll.u32 %s517_s9, 2  ;;  %v170_v1 = vunpack.c.0.s8 %v169_v0  ;;  %v171_v2 = vunpack.c.1.s8 %v169_v0  ;;  %v172_v3 = vunpack.c.2.s8 %v169_v0  ;;  %v173_v4 = vunpack.c.3.s8 %v169_v0 }
  0x40   : > { %s164_s2 = scalar_select %p163_p9, 0.017507004, 0.017429193 }
  0x41   : > { %s165_s18 = scalar_select %p163_p9, -2.0357144, -1.8044444  ;;  %v174_v5 = vand.u32 255, %v170_v1  ;;  %v175_v6 = vand.u32 255, %v171_v2 }
  0x42   : > { %s771_s2 = smov (%p166_p12, %s164_s2), 0.017124753  ;;  %s324_s28 = smul.u32 12, %s521_s10  ;;  %v176_v7 = vand.u32 255, %v172_v3  ;;  %v177_v8 = vand.u32 255, %v173_v4 }
  0x43   : > { %s773_s18 = smov (%p166_p12, %s165_s18), -2.117904  ;;  %v182_v9 = vstv %s771_s2  ;;  %v178_v10 = vcvt.s32.f32 %v174_v5  ;;  %s161_s29 = scalar_lea.vmem [#allocation5], %s317_s3  ;;  %v179_v11 = vcvt.s32.f32 %v175_v6 }
  0x44   : > { %s211_s21 = sadd.s32 %s324_s28, %s319_s19  ;;  %s214_s30 = sshll.u32 %s161_s29, 4  ;;  %v180_v12 = vcvt.s32.f32 %v176_v7  ;;  %v181_v13 = vcvt.s32.f32 %v177_v8  ;;  %v187_v14 = vstv %s773_s18  ;;  %s687_s30 = int_to_ptr.vmem [resolvable:$true] %s214_s30 }
  0x45   : > { %s320_s9 = sshll.u32 %s211_s21, 7  ;;  %v183_v15 = vmul.f32 %v182_v9, %v178_v10  ;;  %v184_v16 = vmul.f32 %v182_v9, %v179_v11  ;;  %s197_s5 = scalar_lea.sflag [#allocation4], %s674_s15 }
  0x46   : > { %v185_v17 = vmul.f32 %v182_v9, %v180_v12  ;;  %v186_v18 = vmul.f32 %v182_v9, %v181_v13  ;;  %s692_s4 = scalar_lea.hbm %s747_s1, %s320_s9  ;;  %s435_s14 = scalar_lea.vmem %s687_s30, 512 }
  0x47   : > { %v188_v19 = vadd.f32 %v187_v14, %v183_v15  ;;  %v189_v20 = vadd.f32 %v187_v14, %v184_v16  ;;  %p436_p8 = scmp.ne.s32.totalorder %s687_s30, %s435_s14  ;;  %p755_p0 = scmp.ne.s32.totalorder %s751_s22, 0 }
  0x48   : > { %v190_v21 = vadd.f32 %v187_v14, %v185_v17  ;;  %v191_v22 = vadd.f32 %v187_v14, %v186_v18  ;;  %s536_s20 = smov [#allocation5]  }
  0x49   : > { %192 = vst [vmem:[%s161_s29] sm:$0xff] %v188_v19  ;;  %193 = vst [vmem:[%s161_s29 + $0x8] sm:$0xff] %v189_v20  ;;  %p437_p11 = pnand %p436_p8, %p755_p0  ;;  %s439_s23 = sshll.u32 %s536_s20, 4  ;;  %s440_s23 = int_to_ptr.vmem [resolvable:$false] %s439_s23 }
  0x4a   : > { %194 = vst [vmem:[%s161_s29 + $0x10] sm:$0xff] %v190_v21  ;;  %195 = vst [vmem:[%s161_s29 + $0x18] sm:$0xff] %v191_v22  ;;  %s441_s24 = scalar_lea.vmem %s440_s23, 1024  ;;  %p442_p2 = scmp.lt.s32.totalorder %s687_s30, %s440_s23 }
  0x4b   : > { %p438_p13 = pneg %p437_p11  ;;  %p443_p4 = scmp.lt.s32.totalorder %s441_s24, %s435_s14 }
  0x4d   : > { %p444_p6 = por %p443_p4, %p442_p2 }
  0x4f   : > { %p445_p7 = pnand %p444_p6, %p438_p13 }
  0x51   : > { %448 = shalt.err (!%p445_p7)
}
  0x52   : > { %s449_s2 = scalar_lea.hbm %s692_s4, 512  ;;  %s453_s19 = scalar_lea.hbm %s747_s1, 3072 }
  0x53   : > { %p450_p10 = scmp.ne.s32.totalorder %s692_s4, %s449_s2  ;;  %p454_p3 = scmp.lt.u32.totalorder %s692_s4, %s747_s1 }
  0x54   : > { %p455_p9 = scmp.lt.u32.totalorder %s453_s19, %s449_s2  ;;  %p457_p8 = scmp.lt.u32.totalorder %s449_s2, %s692_s4 }
  0x55   : > { %p451_p1 = pnand %p450_p10, %p755_p0 }
  0x56   : > { %p456_p12 = por %p455_p9, %p454_p3 }
  0x57   : > { %p452_p5 = pneg %p451_p1 }
  0x58   : > { %p458_p11 = por %p457_p8, %p456_p12 }
  0x5a   : > { %p459_p13 = pnand %p458_p11, %p452_p5 }
  0x5c   : > { %462 = shalt.err (!%p459_p13)
}
  0x5d   : > { %s537_s29 = smov 128   ;;  %s538_s9 = smov 8  }
  0x5e   : > { %327 = dma.vmem_to_hbm [thread:$0]  (%p755_p0), %s687_s30, 512, %s692_s4, %s197_s5, %s537_s29, %s537_s29, %s538_s9  }
  0x5f PF: > { %p338_p2 = scmp.ge.s32.totalorder %s533_s13, 2  ;;  %s229_s10 = sand.u32 1, %s505_s6  }
  0x60   : > { %p756_p4 = scmp.ne.s32.totalorder %s752_s25, 0  ;;  %s230_s26 = scalar_lea.sflag [#allocation4], %s229_s10 }
  0x62   : > { %p334_p6 = pnand %p338_p2, %p756_p4 }
  0x64   : > { %500 = dma.done.wait (!%p334_p6), %s230_s26, 512  }
  0x65   : > { %502 = vsyncadd (!%p334_p6), %s230_s26, 4294966784  ;;  %s17_s13 = sadd.s32 1, %s533_s13   ;;  %s757_s6 = smov %s509_s7 }
  0x66   : > { %p14_p7 = scmp.ge.s32.totalorder %s17_s13, 8   ;;  %s758_s7 = smov %s513_s8 }
  0x67   : > { %s759_s8 = smov %s627_s27  ;;  %s760_s9 = smov %s525_s11 }
  0x68   : > { %s761_s10 = smov %s529_s12  ;;  %s762_s11 = smov %s765_s16 }
  0x69   : > { %s763_s12 = smov %s769_s17  ;;  %16 = sbr.rel (!%p14_p7) target bundleno = 7 (0x7), region = 69 }
  0x70   :  { %235 = vsyncpa [#allocation3], 1 }
  0x71   :  { %237 = vsyncpa [#allocation3 + $0x1], 1 }
  0x72   :  { %238 = vsyncpa [#allocation4], 1 }
  0x73   :  { %240 = vsyncpa [#allocation4 + $0x1], 1 }

</bundles_post_ra>
